<compile_context>
chip_gen: v5e
topology: v5e:2x2
jax: 0.10.0
libtpu: 0.0.40
codegen_flags: <defaults>
</compile_context>

<pallas_src>
import functools
import math

import jax
import jax.numpy as jnp
import numpy as np
from jax.experimental import pallas as pl
from jax.experimental.pallas import tpu as pltpu

_NORM_EPS = 1e-12     # torch.nn.functional.normalize default eps
_CLAMP_EPS = 1e-06    # ArcMarginHeader.epsilon
_PI = 3.14159265358979323846
_PI_2 = 1.57079632679489661923


def _asin_core(x):
    """Cephes asinf polynomial, valid for |x| <= ~0.71. fp32 accuracy ~2.5e-7."""
    z = x * x
    p = jnp.float32(4.2163199048e-2)
    p = p * z + jnp.float32(2.4181311049e-2)
    p = p * z + jnp.float32(4.5470025998e-2)
    p = p * z + jnp.float32(7.4953002686e-2)
    p = p * z + jnp.float32(1.6666752422e-1)
    return p * z * x + x


def _acos(x):
    # torch.acos equivalent built from sqrt/mul/add/select (Cephes acosf scheme);
    # only ever evaluated on a (TB, 1) vector, so its cost is negligible.
    hi = 2.0 * _asin_core(jnp.sqrt(jnp.maximum(0.5 * (1.0 - x), 0.0)))
    lo = _PI - 2.0 * _asin_core(jnp.sqrt(jnp.maximum(0.5 * (1.0 + x), 0.0)))
    mid = _PI_2 - _asin_core(x)
    return jnp.where(x > 0.5, hi, jnp.where(x < -0.5, lo, mid))


def _arcmargin_kernel(x_ref, w_ref, label_ref, out_ref, *, s, m1, m2, m3, tile_c):
    j = pl.program_id(1)                           # which C tile

    # Upcast (inputs may be f32 or bf16) for the norm accumulations.
    x32 = x_ref[...].astype(jnp.float32)           # (TB, Din)
    w32 = w_ref[...].astype(jnp.float32)           # (TC, Din)

    # F.normalize(p=2, dim=1): 1/max(||row||, eps) == rsqrt(max(sum(row^2), eps^2)).
    inv_x = jax.lax.rsqrt(jnp.maximum(jnp.sum(x32 * x32, axis=-1, keepdims=True),
                                      _NORM_EPS * _NORM_EPS))
    inv_w = jax.lax.rsqrt(jnp.maximum(jnp.sum(w32 * w32, axis=-1, keepdims=True),
                                      _NORM_EPS * _NORM_EPS))

    # bf16 operands for the MXU, f32 accumulation.
    x_nb = (x32 * inv_x).astype(jnp.bfloat16)
    w_nb = (w32 * inv_w).astype(jnp.bfloat16)
    logits = jax.lax.dot_general(
        x_nb, w_nb, (((1,), (1,)), ((), ())),
        preferred_element_type=jnp.float32)        # (TB, TC)
    logits = jnp.clip(logits, -1.0 + _CLAMP_EPS, 1.0 - _CLAMP_EPS)

    # one_hot.scatter_(1, label, 1.0) == (global class id == label); offset by tile origin.
    labels = label_ref[...]                                        # (TB, 1) int32
    cls = jax.lax.broadcasted_iota(jnp.int32, logits.shape, 1) + j * tile_c
    mask = cls == labels                                           # (TB, TC) bool

    # Target (label-column) logit per row; 0 for rows whose label is not in this tile
    # (those rows are untouched by the select below, so the value is irrelevant).
    t = jnp.sum(jnp.where(mask, logits, 0.0), axis=-1, keepdims=True)   # (TB, 1)

    # Margin math on (TB, 1) values only.
    if m1 == 1.0:
        # theta = acos(t).clamp(-1, 1) == min(acos(t), 1); cos(theta + m2) closed form.
        cos_m2 = math.cos(m2)
        sin_m2 = math.sin(m2)
        cos_1 = math.cos(1.0)
        cos_1_m2 = math.cos(1.0 + m2)
        unclamped = t * cos_m2 - jnp.sqrt(jnp.maximum(1.0 - t * t, 0.0)) * sin_m2
        target = jnp.where(t >= cos_1, unclamped, cos_1_m2) - m3
    else:
        theta = jnp.clip(_acos(t), -1.0, 1.0)      # faithful to torch's odd clamp
        target = jnp.cos(m1 * theta + m2) - m3

    # output = s * (one_hot * target_logits + (1 - one_hot) * logits)
    out = jnp.where(mask, target, logits) * s
    out_ref[...] = out.astype(out_ref.dtype)


def _pick_tile(dim, preferred):
    for t in preferred:
        if dim >= t and dim % t == 0:
            return t
    return dim


def arcmargin_forward(x, weight, label, *, s=1.0, m1=1.0, m2=0.0, m3=0.0,
                      tb=None, tc=None):
    B, d_in = x.shape
    C, d_in2 = weight.shape
    assert d_in == d_in2

    # Default tiles: biggest "nice" divisors.  With Din<=512 and bf16 MXU operands,
    # tb<=256 / tc<=2048 keeps double-buffered VMEM well under the default scoped
    # limit on every generation (incl. v7x's 64 MiB physical VMEM).
    tb = tb if tb is not None else _pick_tile(B, (256, 128, 64, 32, 16, 8))
    tc = tc if tc is not None else _pick_tile(C, (2048, 1024, 512, 256, 128))
    assert B % tb == 0 and C % tc == 0, "B/C must be divisible by the chosen tiles"

    label2d = label.reshape(B, 1).astype(jnp.int32)
    kernel = functools.partial(_arcmargin_kernel, s=float(s), m1=float(m1),
                               m2=float(m2), m3=float(m3), tile_c=tc)
    return pl.pallas_call(
        kernel,
        out_shape=jax.ShapeDtypeStruct((B, C), jnp.float32),
        grid=(B // tb, C // tc),
        in_specs=[
            pl.BlockSpec((tb, d_in), lambda i, j: (i, 0)),   # x: batch tile i, full Din
            pl.BlockSpec((tc, d_in), lambda i, j: (j, 0)),   # weight: class tile j, full Din
            pl.BlockSpec((tb, 1), lambda i, j: (i, 0)),      # labels: batch tile i
        ],
        out_specs=pl.BlockSpec((tb, tc), lambda i, j: (i, j)),
        compiler_params=pltpu.CompilerParams(
            dimension_semantics=("parallel", "parallel")),   # megacore-shardable
    )(x, weight, label2d)


def _reference(x, weight, label, s, m1, m2, m3):
    """Pure-JAX (f32, HIGHEST) re-statement of the torch forward, for verification."""
    x = x.astype(jnp.float32)
    weight = weight.astype(jnp.float32)
    x_n = x / jnp.maximum(jnp.linalg.norm(x, axis=1, keepdims=True), _NORM_EPS)
    w_n = weight / jnp.maximum(jnp.linalg.norm(weight, axis=1, keepdims=True), _NORM_EPS)
    logits = jnp.matmul(x_n, w_n.T, precision=jax.lax.Precision.HIGHEST)
    logits = jnp.clip(logits, -1.0 + _CLAMP_EPS, 1.0 - _CLAMP_EPS)
    theta = jnp.clip(jnp.arccos(logits), -1.0, 1.0)
    target = jnp.cos(m1 * theta + m2) - m3
    one_hot = jax.nn.one_hot(label, weight.shape[0], dtype=jnp.float32)
    return s * (one_hot * target + (1.0 - one_hot) * logits)


if __name__ == "__main__":
    key = jax.random.PRNGKey(0)
    kx, kw, kl = jax.random.split(key, 3)

    B, in_features, out_features = 16, 256, 512
    x = jax.random.normal(kx, (B, in_features), dtype=jnp.float32)
    bound = 1.0 / np.sqrt(in_features)
    weight = jax.random.uniform(kw, (out_features, in_features),
                                dtype=jnp.float32, minval=-bound, maxval=bound)
    label = jax.random.randint(kl, (B,), 0, out_features, dtype=jnp.int32)

    # Config 1: ArcFace settings (m1 == 1 fast path), f32 HBM inputs, multi-tile grid
    # (tb=8, tc=128 -> 2x4 grid exercises both grid axes / the class-tile offset).
    s1, m1_1, m2_1, m3_1 = 64.0, 1.0, 0.5, 0.0
    out1 = jax.block_until_ready(
        arcmargin_forward(x, weight, label, s=s1, m1=m1_1, m2=m2_1, m3=m3_1,
                          tb=8, tc=128))
    ref1 = _reference(x, weight, label, s1, m1_1, m2_1, m3_1)
    # Tolerance = bf16 MXU-operand quantization bound (~4e-3 in cosine) scaled by s.
    np.testing.assert_allclose(np.asarray(out1), np.asarray(ref1), atol=0.5, rtol=0)

    # Config 2: general margin path (m1 != 1), bf16 HBM inputs, default (single-tile) grid.
    s2, m1_2, m2_2, m3_2 = 30.0, 1.35, 0.25, 0.1
    xb = x.astype(jnp.bfloat16)
    wb = weight.astype(jnp.bfloat16)
    out2 = jax.block_until_ready(
        arcmargin_forward(xb, wb, label, s=s2, m1=m1_2, m2=m2_2, m3=m3_2))
    ref2 = _reference(xb, wb, label, s2, m1_2, m2_2, m3_2)
    np.testing.assert_allclose(np.asarray(out2), np.asarray(ref2), atol=0.25, rtol=0)

    print("KERNEL_OK")
</pallas_src>

<mosaic_0001>
module attributes {stable_mosaic.version = 11 : i64} {
  func.func @_arcmargin_kernel(%arg0: i32, %arg1: i32, %arg2: memref<8x256xf32, #tpu.memory_space<vmem>>, %arg3: memref<128x256xf32, #tpu.memory_space<vmem>>, %arg4: memref<8x1xi32, #tpu.memory_space<vmem>>, %arg5: memref<8x128xf32, #tpu.memory_space<vmem>>) attributes {dimension_semantics = [#tpu.dimension_semantics<parallel>, #tpu.dimension_semantics<parallel>], iteration_bounds = array<i64: 2, 4>, scalar_prefetch = 0 : i64, scratch_operands = 0 : i64, tpu.core_type = #tpu.core_type<tc>, window_params = [{transform_indices = @transform_0, window_bounds = array<i64: 8, 256>}, {transform_indices = @transform_1, window_bounds = array<i64: 128, 256>}, {transform_indices = @transform_2, window_bounds = array<i64: 8, 1>}, {transform_indices = @transform_3, window_bounds = array<i64: 8, 128>}]} {
    %c0 = arith.constant 0 : index
    %c0_0 = arith.constant 0 : index
    %0 = vector.load %arg2[%c0, %c0_0] : memref<8x256xf32, #tpu.memory_space<vmem>>, vector<8x256xf32>
    %c0_1 = arith.constant 0 : index
    %c0_2 = arith.constant 0 : index
    %1 = vector.load %arg3[%c0_1, %c0_2] : memref<128x256xf32, #tpu.memory_space<vmem>>, vector<128x256xf32>
    %2 = arith.mulf %0, %0 : vector<8x256xf32>
    %cst = arith.constant dense<0.000000e+00> : vector<8xf32>
    %3 = vector.multi_reduction <add>, %2, %cst [1] : vector<8x256xf32> to vector<8xf32>
    %4 = vector.shape_cast %3 : vector<8xf32> to vector<8x1xf32>
    %cst_3 = arith.constant 1.000000e-24 : f32
    %5 = vector.broadcast %cst_3 : f32 to vector<8x1xf32>
    %6 = arith.maximumf %4, %5 : vector<8x1xf32>
    %7 = math.rsqrt %6 : vector<8x1xf32>
    %8 = arith.mulf %1, %1 : vector<128x256xf32>
    %cst_4 = arith.constant dense<0.000000e+00> : vector<128xf32>
    %9 = vector.multi_reduction <add>, %8, %cst_4 [1] : vector<128x256xf32> to vector<128xf32>
    %10 = vector.shape_cast %9 : vector<128xf32> to vector<128x1xf32>
    %cst_5 = arith.constant 1.000000e-24 : f32
    %11 = vector.broadcast %cst_5 : f32 to vector<128x1xf32>
    %12 = arith.maximumf %10, %11 : vector<128x1xf32>
    %13 = math.rsqrt %12 : vector<128x1xf32>
    %14 = vector.broadcast %7 : vector<8x1xf32> to vector<8x256xf32>
    %15 = arith.mulf %0, %14 : vector<8x256xf32>
    %16 = arith.truncf %15 : vector<8x256xf32> to vector<8x256xbf16>
    %17 = vector.broadcast %13 : vector<128x1xf32> to vector<128x256xf32>
    %18 = arith.mulf %1, %17 : vector<128x256xf32>
    %19 = arith.truncf %18 : vector<128x256xf32> to vector<128x256xbf16>
    %cst_6 = arith.constant dense<0.000000e+00> : vector<8x128xf32>
    %20 = tpu.matmul %16, %19, %cst_6 {dimension_numbers = #tpu.dot_dimension_numbers<[1], [1], [0], [0], [0, 0, 1, 0], [], []>} : vector<8x256xbf16>, vector<128x256xbf16>, vector<8x128xf32> -> vector<8x128xf32>
    %cst_7 = arith.constant -0.999998986 : f32
    %cst_8 = arith.constant 0.999998986 : f32
    %21 = vector.broadcast %cst_7 : f32 to vector<8x128xf32>
    %22 = arith.maximumf %21, %20 : vector<8x128xf32>
    %23 = vector.broadcast %cst_8 : f32 to vector<8x128xf32>
    %24 = arith.minimumf %23, %22 : vector<8x128xf32>
    %c0_9 = arith.constant 0 : index
    %c0_10 = arith.constant 0 : index
    %25 = vector.load %arg4[%c0_9, %c0_10] : memref<8x1xi32, #tpu.memory_space<vmem>>, vector<8x1xi32>
    %26 = tpu.iota {dimensions = array<i32: 1>} : vector<8x128xi32>
    %c128_i32 = arith.constant 128 : i32
    %27 = arith.muli %arg1, %c128_i32 : i32
    %28 = vector.broadcast %27 : i32 to vector<8x128xi32>
    %29 = arith.addi %26, %28 : vector<8x128xi32>
    %30 = vector.broadcast %25 : vector<8x1xi32> to vector<8x128xi32>
    %31 = arith.cmpi eq, %29, %30 : vector<8x128xi32>
    %cst_11 = arith.constant 0.000000e+00 : f32
    %32 = vector.broadcast %cst_11 : f32 to vector<8x128xf32>
    %33 = arith.select %31, %24, %32 : vector<8x128xi1>, vector<8x128xf32>
    %cst_12 = arith.constant dense<0.000000e+00> : vector<8xf32>
    %34 = vector.multi_reduction <add>, %33, %cst_12 [1] : vector<8x128xf32> to vector<8xf32>
    %35 = vector.shape_cast %34 : vector<8xf32> to vector<8x1xf32>
    %cst_13 = arith.constant 0.87758255 : f32
    %36 = vector.broadcast %cst_13 : f32 to vector<8x1xf32>
    %37 = arith.mulf %35, %36 : vector<8x1xf32>
    %38 = arith.mulf %35, %35 : vector<8x1xf32>
    %cst_14 = arith.constant 1.000000e+00 : f32
    %39 = vector.broadcast %cst_14 : f32 to vector<8x1xf32>
    %40 = arith.subf %39, %38 : vector<8x1xf32>
    %cst_15 = arith.constant 0.000000e+00 : f32
    %41 = vector.broadcast %cst_15 : f32 to vector<8x1xf32>
    %42 = arith.maximumf %40, %41 : vector<8x1xf32>
    %43 = math.sqrt %42 : vector<8x1xf32>
    %cst_16 = arith.constant 0.47942555 : f32
    %44 = vector.broadcast %cst_16 : f32 to vector<8x1xf32>
    %45 = arith.mulf %43, %44 : vector<8x1xf32>
    %46 = arith.subf %37, %45 : vector<8x1xf32>
    %cst_17 = arith.constant 0.540302277 : f32
    %47 = vector.broadcast %cst_17 : f32 to vector<8x1xf32>
    %48 = arith.cmpf oge, %35, %47 : vector<8x1xf32>
    %cst_18 = arith.constant 7.073720e-02 : f32
    %49 = vector.broadcast %cst_18 : f32 to vector<8x1xf32>
    %50 = arith.select %48, %46, %49 : vector<8x1xi1>, vector<8x1xf32>
    %cst_19 = arith.constant 0.000000e+00 : f32
    %51 = vector.broadcast %cst_19 : f32 to vector<8x1xf32>
    %52 = arith.subf %50, %51 : vector<8x1xf32>
    %53 = vector.shape_cast %52 : vector<8x1xf32> to vector<8x1xf32>
    %54 = vector.broadcast %53 : vector<8x1xf32> to vector<8x128xf32>
    %55 = arith.select %31, %54, %24 : vector<8x128xi1>, vector<8x128xf32>
    %cst_20 = arith.constant 6.400000e+01 : f32
    %56 = vector.broadcast %cst_20 : f32 to vector<8x128xf32>
    %57 = arith.mulf %55, %56 : vector<8x128xf32>
    %c0_21 = arith.constant 0 : index
    %c0_22 = arith.constant 0 : index
    %58 = vector.load %arg5[%c0_21, %c0_22] : memref<8x128xf32, #tpu.memory_space<vmem>>, vector<8x128xf32>
    tpu.vector_store %arg5[%c0_21, %c0_22], %57 {strides = array<i32>} : memref<8x128xf32, #tpu.memory_space<vmem>>, vector<8x128xf32>,
    return
  }
  func.func @transform_0(%arg0: i32, %arg1: i32) -> (i32, i32) {
    %c0_i32 = arith.constant 0 : i32
    %c0_i32_0 = arith.constant 0 : i32
    return %arg0, %c0_i32 : i32, i32
  }
  func.func @transform_1(%arg0: i32, %arg1: i32) -> (i32, i32) {
    %c0_i32 = arith.constant 0 : i32
    %c0_i32_0 = arith.constant 0 : i32
    return %arg1, %c0_i32 : i32, i32
  }
  func.func @transform_2(%arg0: i32, %arg1: i32) -> (i32, i32) {
    %c0_i32 = arith.constant 0 : i32
    %c0_i32_0 = arith.constant 0 : i32
    return %arg0, %c0_i32 : i32, i32
  }
  func.func @transform_3(%arg0: i32, %arg1: i32) -> (i32, i32) {
    %c0_i32 = arith.constant 0 : i32
    return %arg0, %arg1 : i32, i32
  }
}

</mosaic_0001>

<bundles_post_ra>
// kernel: tpu_custom_call.1
= control target key start
LH: loop header
LB: loop body
LE: loop exit
PB: predicated region body
PF: predicated region fallthrough
CT: control target
= control target key end

     0   :  { %s1949_s0 = inlined_call_operand.hbm [shape: f32[16,256], index: 0, kind: input, shape index: {}]   ;;  %s1950_s1 = inlined_call_operand.hbm [shape: f32[512,256], index: 1, kind: input, shape index: {}]   ;;  %s1951_s2 = inlined_call_operand.vmem [shape: s32[16,1], index: 2, kind: input, shape index: {}]   ;;  %s1952_s3 = inlined_call_operand.hbm [shape: f32[16,512], index: 3, kind: output, shape index: {}]  }
   0x1   :  { %1968 = sst [smem:[#allocation23_spill]] %s1949_s0 }
   0x2   :  { %1969 = sst [smem:[#allocation24_spill]] %s1951_s2 }
   0x3   :  { %1970 = sst [smem:[#allocation25_spill]] %s1952_s3 }
   0x4   :  { %8 = vsyncpa [#allocation3], 0 }
   0x5   :  { %10 = vsyncpa [#allocation3 + $0x1], 0 }
   0x6   :  { %11 = vsyncpa [#allocation6], 0 }
   0x7   :  { %13 = vsyncpa [#allocation6 + $0x1], 0 }
   0x8   :  { %14 = vsyncpa [#allocation4], 0 }
   0x9   :  { %16 = vsyncpa [#allocation4 + $0x1], 0  ;;  %s1255_s12 = smov 0   ;;  %s1257_s13 = smov 0  }
   0xa   :  { %s1259_s14 = smov 0   ;;  %s1261_s15 = smov 0  }
   0xb   :  { %s1263_s16 = smov 0   ;;  %s1265_s17 = smov 0  }
   0xc   :  { %s1267_s18 = smov 0   ;;  %s1269_s19 = smov 0  }
   0xd   :  { %s1271_s20 = smov 0   ;;  %s1273_s21 = smov 0  }
   0xe   :  { %s1275_s22 = smov 0   ;;  %s1277_s23 = smov 0  }
   0xf   :  { %s1279_s24 = smov 0   ;;  %s1281_s25 = smov 0  }
  0x10 LB: > { %1971 = sst [smem:[#allocation11_spill]] %s1178_s12  ;;  %s822_s26 = sadd.s32 4294967295, %s1230_s25   ;;  %s1230_s25 = sphi %s1281_s25, %s22_s25   ;;  %s1226_s24 = sphi %s1279_s24, %s2028_s24   ;;  %s1222_s23 = sphi %s1277_s23, %s2027_s23   ;;  %s1218_s22 = sphi %s1275_s22, %s2026_s22   ;;  %s1214_s21 = sphi %s1273_s21, %s2015_s21   ;;  %s1210_s20 = sphi %s1271_s20, %s2025_s20   ;;  %s1206_s19 = sphi %s1269_s19, %s2024_s19   ;;  %s1202_s18 = sphi %s1267_s18, %s2023_s18   ;;  %s1198_s17 = sphi %s1265_s17, %s2022_s17   ;;  %s1194_s16 = sphi %s1263_s16, %s2021_s16   ;;  %s1190_s15 = sphi %s1261_s15, %s2020_s15   ;;  %s1186_s14 = sphi %s1259_s14, %s2019_s14   ;;  %s1182_s13 = sphi %s1257_s13, %s2018_s13   ;;  %s1178_s12 = sphi %s1255_s12, %s2014_s12  }
  0x11   : > { %1972 = sst [smem:[#allocation12_spill]] %s1182_s13  ;;  %s823_s27 = sadd.s32 4294967294, %s1230_s25  }
  0x12   : > { %1973 = sst [smem:[#allocation13_spill]] %s1214_s21  ;;  %p48_p0 = scmp.ne.s32.totalorder %s1210_s20, %s1206_s19 }
  0x13   : > { %1974 = sst [smem:[#allocation14_spill]] %s1222_s23  ;;  %p49_p1 = scmp.eq.s32.totalorder %s1230_s25, 0 }
  0x14   : > { %1975 = sst [smem:[#allocation15_spill]] %s1230_s25  ;;  %p54_p2 = scmp.ne.s32.totalorder %s1206_s19, %s1202_s18 }
  0x15   : > { %p55_p3 = scmp.eq.s32.totalorder %s822_s26, 0  ;;  %p1329_p4 = por %p49_p1, %p48_p0 }
  0x16   : > { %p74_p5 = scmp.ne.s32.totalorder %s1198_s17, %s1194_s16  ;;  %p80_p7 = scmp.ne.s32.totalorder %s1194_s16, %s1190_s15 }
  0x17   : > { %p1335_p6 = por %p55_p3, %p54_p2  ;;  %p131_p9 = scmp.ne.s32.totalorder %s1186_s14, %s1182_s13 }
  0x18   : > { %p1340_p8 = por %p74_p5, %p49_p1  ;;  %p1346_p10 = por %p80_p7, %p55_p3 }
  0x19   : > { %p132_p11 = scmp.eq.s32.totalorder %s822_s26, 7  ;;  %p137_p12 = scmp.ne.s32.totalorder %s1182_s13, %s1178_s12 }
  0x1a   : > { %p138_p13 = scmp.eq.s32.totalorder %s823_s27, 7  ;;  %p865_p2 = scmp.lt.s32.totalorder %s1230_s25, 8 }
  0x1b   : > { %p1352_p0 = por %p132_p11, %p131_p9  ;;  %s158_s9 = sand.u32 1, %s1210_s20  }
  0x1c   : > { %p1356_p1 = por %p138_p13, %p137_p12  ;;  %s845_s10 = sshll.u32 %s1226_s24, 4 }
  0x1d   : > { %s1980_s7 = scalar_select %p1352_p0, 1, 0 }
  0x1e   : > { %s1982_s8 = scalar_select %p1356_p1, 1, 0 }
  0x1f   : > { %1981 = sst [smem:[#allocation16_spill]] %s1980_s7  ;;  %s826_s11 = sshll.u32 %s158_s9, 4 }
  0x20   : > { %1983 = sst [smem:[#allocation17_spill]] %s1982_s8  ;;  %s162_s29 = scalar_lea.vmem [#allocation2], %s826_s11 }
  0x21   : > { %s1984_s0 = sld [smem:[#allocation23_spill]]  ;;  %s171_s28 = sshll.u32 %s162_s29, 4  ;;  %s172_s28 = int_to_ptr.vmem [resolvable:$true] %s171_s28 }
  0x22   : > { %p855_p3 = pnand %p865_p2, %p1329_p4  ;;  %p1370_p5 = pnand %p865_p2, %p1340_p8 }
  0x23   : > { %p833_p7 = scmp.ge.s32.totalorder %s1230_s25, 1  ;;  %p206_p9 = scmp.lt.s32.totalorder %s1230_s25, 9 }
  0x24   : > { %s67_s29 = sadd.s32 1, %s1198_s17  ;;  %s31_s30 = sadd.s32 1, %s1222_s23 }
  0x25   : > { %p1376_p11 = pnand %p833_p7, %p206_p9  ;;  %s121_s15 = sadd.s32 1, %s1186_s14 }
  0x26   : > { %p32_p4 = scmp.ge.s32.totalorder %s31_s30, 4  ;;  %s178_s5 = sand.u32 1, %s1198_s17  }
  0x27   : > { %s167_s26 = scalar_lea.hbm %s1984_s0, %s845_s10  ;;  %s159_s10 = scalar_lea.sflag [#allocation3], %s158_s9 }
  0x28   : > { %s169_s27 = sshll.u32 %s167_s26, 4  ;;  %s829_s18 = sshll.u32 %s178_s5, 8  ;;  %s170_s27 = int_to_ptr.hbm [resolvable:$true] %s169_s27 }
  0x29   : > { %857 = dma.hbm_to_vmem [thread:$0]  (!%p855_p3), %s170_s27, 256, %s172_s28, %s159_s10  }
  0x2a   : > { %s2030_s30 = smov (%p32_p4, %s31_s30), 0  ;;  %s1988_s26 = sadd.s32 1, %s1226_s24 }
  0x2b   : > { %1987 = sst [smem:[#allocation18_spill]] %s2030_s30  ;;  %s2032_s26 = smov (!%p32_p4, %s1988_s26), %s1226_s24 }
  0x2c   : > { %s64_s28 = ssub.s32 %s1222_s23, %s2030_s30  ;;  %p36_p8 = scmp.ge.s32.totalorder %s2032_s26, 2 }
  0x2d   : > { %p65_p12 = scmp.eq.s32.totalorder %s64_s28, 0  ;;  %s847_s9 = sshll.u32 %s1222_s23, 8 }
  0x2e   : > { %s182_s27 = scalar_lea.vmem [#allocation5], %s829_s18  ;;  %s2034_s26 = smov (%p36_p8, %s2032_s26), 0 }
  0x2f   : > { %s191_s10 = sshll.u32 %s182_s27, 4  ;;  %s38_s12 = ssub.s32 %s1226_s24, %s2034_s26  ;;  %s192_s10 = int_to_ptr.vmem [resolvable:$true] %s191_s10 }
  0x30   : > { %s1395_s0 = scalar_select %p65_p12, %s1198_s17, %s67_s29  }
  0x31   : > { %s188_s3 = scalar_lea.hbm %s1950_s1, %s847_s9  ;;  %p39_p13 = scmp.eq.s32.totalorder %s38_s12, 0 }
  0x32   : > { %s118_s13 = sor.u32 %s64_s28, %s38_s12  ;;  %s189_s30 = sshll.u32 %s188_s3, 4  ;;  %s190_s30 = int_to_ptr.hbm [resolvable:$true] %s189_s30 }
  0x33   : > { %p119_p2 = scmp.eq.s32.totalorder %s118_s13, 0  ;;  %s1989_s21 = sadd.s32 1, %s1210_s20 }
  0x34   : > { %s1405_s2 = scalar_select %p39_p13, %s1210_s20, %s1989_s21  }
  0x35   : > { %s1408_s18 = scalar_select %p119_p2, %s1186_s14, %s121_s15  }
  0x36   : > { %s179_s27 = scalar_lea.sflag [#allocation6], %s178_s5  ;;  %s1232_s23 = smov 256  }
  0x37   : > { %s1233_s29 = smov 16   ;;  %210 = sbr.rel (%p1376_p11) target bundleno = 569 (0x239), region = 32 }
  0x38   : > { %860 = dma.hbm_to_vmem [thread:$0]  (!%p1370_p5), %s190_s30, 4096, %s192_s10, %s179_s27, %s1232_s23, %s1232_s23, %s1233_s29  }
  0x3c   : > { %s212_s12 = sand.u32 1, %s1206_s19  }
  0x3d   : > { %s1415_s13 = sshll.u32 %s212_s12, 4  ;;  %s213_s3 = scalar_lea.sflag [#allocation3], %s212_s12 }
  0x3e   : > { %s216_s21 = scalar_lea.vmem [#allocation2], %s1415_s13 }
  0x3f   : > { %1165 = dma.done.wait (%p1335_p6), %s213_s3, 256  }
  0x40   : > { %1167 = vsyncadd (%p1335_p6), %s213_s3, 4294967040  ;;  %s222_s25 = sand.u32 1, %s1194_s16  }
  0x41   : > { %s835_s23 = sshll.u32 %s222_s25, 8  ;;  %s223_s7 = scalar_lea.sflag [#allocation6], %s222_s25 }
  0x42   : > { %s1423_s8 = scalar_lea.vmem [#allocation5], %s835_s23 }
  0x43   : > { %1169 = dma.done.wait (%p1346_p10), %s223_s7, 4096  }
  0x44   : > { %1171 = vsyncadd (%p1346_p10), %s223_s7, 4294963200  ;;  %v1430_v0 = vld [vmem:[%s1423_s8 + $0xe0] sm:$0xff]  ;;  %v1433_v1 = vld [vmem:[%s1423_s8 + $0xe8] sm:$0xff]  ;;  %p260_p6 = scmp.lt.s32.totalorder %s1218_s22, 1  ;;  %s2000_s15 = sld [smem:[#allocation24_spill]] }
  0x45   : > { %v1436_v2 = vld [vmem:[%s1423_s8 + $0xc0] sm:$0xff]  ;;  %v342_v3 = vmul.f32 %v1430_v0, %v1430_v0  ;;  %v343_v4 = vmul.f32 %v1433_v1, %v1433_v1  ;;  %v1443_v5 = vld [vmem:[%s1423_s8 + $0xc8] sm:$0xff]  ;;  %v1460_v12 = vld [vmem:[%s1423_s8 + $0xf0] sm:$0xff]  ;;  %s2002_s28 = sld [smem:[#allocation13_spill]]  ;;  %s841_s27 = sshll.u32 %s1218_s22, 2 }
  0x46   : > { %v338_v6 = vmul.f32 %v1436_v2, %v1436_v2  ;;  %v1448_v7 = vld [vmem:[%s1423_s8 + $0xa0] sm:$0xff]  ;;  %v1451_v8 = vld [vmem:[%s1423_s8 + $0xa8] sm:$0xff]  ;;  %v339_v9 = vmul.f32 %v1443_v5, %v1443_v5  ;;  %v1463_v13 = vld [vmem:[%s1423_s8 + $0xf8] sm:$0xff]  ;;  %v344_v21 = vmul.f32 %v1460_v12, %v1460_v12  ;;  %s1801_s4 = scalar_select %p260_p6, %s1218_s22, 1 }
  0x47   : > { %v334_v10 = vmul.f32 %v1448_v7, %v1448_v7  ;;  %v335_v11 = vmul.f32 %v1451_v8, %v1451_v8  ;;  %v1466_v14 = vld [vmem:[%s1423_s8 + $0xd0] sm:$0xff]  ;;  %v388_v15 = vadd.f32 %v343_v4, %v342_v3  ;;  %v1469_v16 = vld [vmem:[%s1423_s8 + $0xd8] sm:$0xff]  ;;  %v345_v22 = vmul.f32 %v1463_v13, %v1463_v13  ;;  %v1493_v31 = vld [vmem:[%s1423_s8 + $0x80] sm:$0xff]  ;;  %s2006_s10 = sld [smem:[#allocation12_spill]] }
  0x48   : > { %v1472_v17 = vld [vmem:[%s1423_s8 + $0xb0] sm:$0xff]  ;;  %v1475_v18 = vld [vmem:[%s1423_s8 + $0xb8] sm:$0xff]  ;;  %v382_v19 = vadd.f32 %v339_v9, %v338_v6  ;;  %v340_v23 = vmul.f32 %v1466_v14, %v1466_v14  ;;  %v341_v24 = vmul.f32 %v1469_v16, %v1469_v16  ;;  %v1496_v32 = vld [vmem:[%s1423_s8 + $0x88] sm:$0xff]  ;;  %v330_v37 = vmul.f32 %v1493_v31, %v1493_v31  ;;  %s837_s6 = sshll.u32 %s1801_s4, 3  ;;  %s2007_s23 = sld [smem:[#allocation25_spill]] }
  0x49   : > { %v376_v20 = vadd.f32 %v335_v11, %v334_v10  ;;  %389 = vadd.xlane.f32.xlu0 %v388_v15  ;;  %v336_v25 = vmul.f32 %v1472_v17, %v1472_v17  ;;  %v337_v26 = vmul.f32 %v1475_v18, %v1475_v18  ;;  %v391_v27 = vadd.f32 %v345_v22, %v344_v21  ;;  %v1490_v30 = vld [vmem:[%s1423_s8 + $0x90] sm:$0xff]  ;;  %v1499_v33 = vld [vmem:[%s1423_s8 + $0x98] sm:$0xff]  ;;  %v1502_v34 = vld [vmem:[%s1423_s8 + $0x60] sm:$0xff] }
  0x4a   : > { %383 = vadd.xlane.f32.xlu1 %v382_v19  ;;  %v385_v28 = vadd.f32 %v341_v24, %v340_v23  ;;  %v1505_v35 = vld [vmem:[%s1423_s8 + $0x68] sm:$0xff]  ;;  %v332_v36 = vmul.f32 %v1490_v30, %v1490_v30  ;;  %v331_v38 = vmul.f32 %v1496_v32, %v1496_v32  ;;  %v333_v39 = vmul.f32 %v1499_v33, %v1499_v33  ;;  %v1520_v44 = vld [vmem:[%s1423_s8 + $0x70] sm:$0xff]  ;;  %v1523_v45 = vld [vmem:[%s1423_s8 + $0x78] sm:$0xff]  ;;  %s263_s5 = scalar_lea.vmem %s2000_s15, %s837_s6 }
  0x4b   : > { %377 = vadd.xlane.f32.xlu2 %v376_v20  ;;  %v379_v29 = vadd.f32 %v337_v26, %v336_v25  ;;  %v326_v40 = vmul.f32 %v1502_v34, %v1502_v34  ;;  %v327_v41 = vmul.f32 %v1505_v35, %v1505_v35  ;;  %v1526_v47 = vld [vmem:[%s1423_s8 + $0x50] sm:$0xff]  ;;  %v1529_v48 = vld [vmem:[%s1423_s8 + $0x58] sm:$0xff]  ;;  %v1532_v49 = vld [vmem:[%s1423_s8 + $0x40] sm:$0xff]  ;;  %v328_v51 = vmul.f32 %v1520_v44, %v1520_v44  ;;  %s839_s9 = sshll.u32 %s2002_s28, 7  ;;  %s697_s12 = sadd.s32 %s2002_s28, %s841_s27 }
  0x4c   : > { %v370_v42 = vadd.f32 %v331_v38, %v330_v37  ;;  %v373_v43 = vadd.f32 %v333_v39, %v332_v36  ;;  %v1535_v50 = vld [vmem:[%s1423_s8 + $0x48] sm:$0xff]  ;;  %v329_v52 = vmul.f32 %v1523_v45, %v1523_v45  ;;  %v324_v53 = vmul.f32 %v1526_v47, %v1526_v47  ;;  %v1550_v60 = vld [vmem:[%s1423_s8 + $0x30] sm:$0xff]  ;;  %v1553_v61 = vld [vmem:[%s1423_s8 + $0x20] sm:$0xff]  ;;  %s842_s3 = sshll.u32 %s697_s12, 3 }
  0x4d   : > { %v364_v46 = vadd.f32 %v327_v41, %v326_v40  ;;  %v325_v54 = vmul.f32 %v1529_v48, %v1529_v48  ;;  %v322_v55 = vmul.f32 %v1532_v49, %v1532_v49  ;;  %v323_v56 = vmul.f32 %v1535_v50, %v1535_v50  ;;  %v1556_v62 = vld [vmem:[%s1423_s8 + $0x28] sm:$0xff]  ;;  %v1559_v63 = vld [vmem:[%s1423_s8 + $0x38] sm:$0xff]  ;;  %v1562_v3 = vld [vmem:[%s1423_s8] sm:$0xff]  ;;  %s256_s29 = sand.u32 1, %s2006_s10  }
  0x4e   : > { %v367_v57 = vadd.f32 %v329_v52, %v328_v51  ;;  %v1565_v4 = vld [vmem:[%s1423_s8 + $0x8] sm:$0xff]  ;;  %v320_v6 = vmul.f32 %v1550_v60, %v1550_v60  ;;  %v318_v9 = vmul.f32 %v1553_v61, %v1553_v61  ;;  %v319_v10 = vmul.f32 %v1556_v62, %v1556_v62  ;;  %v1580_v22 = vld [vmem:[%s1423_s8 + $0x10] sm:$0xff]  ;;  %v1583_v23 = vld [vmem:[%s1423_s8 + $0x18] sm:$0xff]  ;;  %s836_s13 = sshll.u32 %s256_s29, 3  ;;  %s2008_s7 = smov %s2007_s23 }
  0x4f   : > { %v361_v58 = vadd.f32 %v325_v54, %v324_v53  ;;  %v358_v59 = vadd.f32 %v323_v56, %v322_v55  ;;  %1990 = vst [vmem:[#allocation19_spill] sm:$0xff] %v1565_v4  ;;  %v321_v11 = vmul.f32 %v1559_v63, %v1559_v63  ;;  %v314_v15 = vmul.f32 %v1562_v3, %v1562_v3  ;;  %v1587_v25 = vld [vmem:[%s216_s21] sm:$0xff]  ;;  %v1591_v26 = vld [vmem:[%s216_s21 + $0x8] sm:$0xff]  ;;  %s699_s8 = scalar_lea.hbm %s2007_s23, %s842_s3  ;;  %s258_s4 = scalar_lea.vmem [#allocation7], %s836_s13 }
  0x50   : > { %v315_v19 = vmul.f32 %v1565_v4, %v1565_v4  ;;  %v352_v20 = vadd.f32 %v319_v10, %v318_v9  ;;  %1991 = vst [vmem:[#allocation20_spill] sm:$0xff] %v1583_v23  ;;  %v299_v36 = vmul.f32 %v1591_v26, %v1591_v26  ;;  %s701_s6 = sshll.u32 %s258_s4, 4  ;;  %s703_s11 = sshll.u32 %s699_s8, 4  ;;  %s702_s6 = int_to_ptr.vmem [resolvable:$true] %s701_s6  ;;  %s704_s11 = int_to_ptr.hbm [resolvable:$true] %s703_s11 }
  0x51   : > { %392 = vadd.xlane.f32.xlu0 %v391_v27  ;;  %v355_v21 = vadd.f32 %v321_v11, %v320_v6  ;;  %1992 = vst [vmem:[#allocation21_spill] sm:$0xff] %v1587_v25  ;;  %v316_v27 = vmul.f32 %v1580_v22, %v1580_v22  ;;  %s687_s30 = scalar_lea.sflag [#allocation4], %s256_s29  ;;  %s1094_s15 = sshra.s32 %s704_s11, 4  ;;  %s1095_s15 = int_to_ptr.hbm [resolvable:$true] %s1094_s15 }
  0x52   : > { %386 = vadd.xlane.f32.xlu1 %v385_v28  ;;  %v346_v24 = vadd.f32 %v315_v19, %v314_v15  ;;  %1993 = vst [vmem:[#allocation22_spill] sm:$0xff] %v1591_v26  ;;  %v317_v28 = vmul.f32 %v1583_v23, %v1583_v23  ;;  %s1100_s10 = scalar_lea.hbm %s2008_s7, 64  ;;  %p1101_p7 = scmp.lt.s32.totalorder %s1095_s15, %s2008_s7 }
  0x53   : > { %380 = vadd.xlane.f32.xlu2 %v379_v29  ;;  %v298_v29 = vmul.f32 %v1587_v25, %v1587_v25 }
  0x54   : > { %v349_v37 = vadd.f32 %v317_v28, %v316_v27 }
  0x55   : > { %v300_v38 = vadd.f32 %v299_v36, %v298_v29 }
  0x59   : > { %371 = vadd.xlane.f32.xlu0 %v370_v42 }
  0x5a   : > { %374 = vadd.xlane.f32.xlu1 %v373_v43 }
  0x5b   : > { %365 = vadd.xlane.f32.xlu2 %v364_v46 }
  0x61   : > { %368 = vadd.xlane.f32.xlu0 %v367_v57 }
  0x62   : > { %359 = vadd.xlane.f32.xlu1 %v358_v59 }
  0x63   : > { %362 = vadd.xlane.f32.xlu2 %v361_v58 }
  0x69   : > { %353 = vadd.xlane.f32.xlu0 %v352_v20 }
  0x6a   : > { %356 = vadd.xlane.f32.xlu1 %v355_v21 }
  0x6b   : > { %347 = vadd.xlane.f32.xlu2 %v346_v24 }
  0x71   : > { %350 = vadd.xlane.f32.xlu0 %v349_v37 }
  0x72   : > { %301 = vadd.xlane.f32.xlu1 %v300_v38 }
  0xbc   : > { %v390_v39 = vpop.xlane.xlu0 %389 }
  0xbd   : > { %v408_v40 = vmax.f32 %v390_v39, 1e-24  ;;  %v384_v41 = vpop.xlane.xlu1 %383 }
  0xbe   : > { %v378_v42 = vpop.xlane.xlu2 %377  ;;  %v1601_v43 = vmax.f32 %v384_v41, 1e-24 }
  0xbf   : > { %984 = vrsqrt.f32 %v408_v40  ;;  %v1604_v46 = vmax.f32 %v378_v42, 1e-24  ;;  %vm556_vm1 = vweird.f32 %v408_v40 }
  0xc0   : > { %986 = vrsqrt.f32 %v1601_v43  ;;  %vm536_vm3 = vweird.f32 %v1601_v43 }
  0xc1   : > { %988 = vrsqrt.f32 %v1604_v46  ;;  %vm516_vm10 = vweird.f32 %v1604_v46 }
  0xc4   : > { %v393_v51 = vpop.xlane.xlu0 %392 }
  0xc5   : > { %v985_v52 = vpop.eup %984  ;;  %v409_v53 = vmax.f32 %v393_v51, 1e-24  ;;  %v387_v54 = vpop.xlane.xlu1 %386 }
  0xc6   : > { %v381_v55 = vpop.xlane.xlu2 %380  ;;  %v551_v56 = vmul.f32 %v985_v52, %v408_v40  ;;  %v1607_v57 = vmax.f32 %v387_v54, 1e-24  ;;  %v1611_v59 = vpop.eup %986  ;;  %vm557_vm0 = vweird.f32 %v985_v52 }
  0xc7   : > { %v1609_v58 = vmax.f32 %v381_v55, 1e-24  ;;  %990 = vrsqrt.f32 %v409_v53  ;;  %v531_v10 = vmul.f32 %v1611_v59, %v1601_v43  ;;  %v1617_v11 = vpop.eup %988  ;;  %vm558_vm4 = vmor %vm556_vm1, %vm557_vm0  ;;  %vm566_vm5 = vweird.f32 %v409_v53 }
  0xc8   : > { %v552_v6 = vmul.f32 %v985_v52, %v551_v56  ;;  %992 = vrsqrt.f32 %v1607_v57  ;;  %v511_v39 = vmul.f32 %v1617_v11, %v1604_v46  ;;  %vm537_vm6 = vweird.f32 %v1611_v59 }
  0xc9   : > { %994 = vrsqrt.f32 %v1609_v58  ;;  %v532_v28 = vmul.f32 %v1611_v59, %v531_v10  ;;  %vm546_vm7 = vweird.f32 %v1607_v57  ;;  %vm538_vm11 = vmor %vm536_vm3, %vm537_vm6  ;;  %vm517_vm12 = vweird.f32 %v1617_v11 }
  0xca   : > { %v553_v9 = vmul.f32 0.5, %v552_v6  ;;  %v512_v10 = vmul.f32 %v1617_v11, %v511_v39  ;;  %vm526_vm13 = vweird.f32 %v1609_v58  ;;  %vm1711_vm1 = vmor %vm516_vm10, %vm517_vm12 }
  0xcb   : > { %v533_v56 = vmul.f32 0.5, %v532_v28 }
  0xcc   : > { %v372_v15 = vpop.xlane.xlu0 %371  ;;  %v554_v27 = vsub.f32 1.5, %v553_v9 }
  0xcd   : > { %v991_v19 = vpop.eup %990  ;;  %v375_v20 = vpop.xlane.xlu1 %374  ;;  %v1619_v21 = vmax.f32 %v372_v15, 1e-24  ;;  %v534_v28 = vsub.f32 1.5, %v533_v56 }
  0xce   : > { %v1621_v24 = vpop.eup %992  ;;  %v561_v29 = vmul.f32 %v991_v19, %v409_v53  ;;  %v1624_v36 = vmax.f32 %v375_v20, 1e-24  ;;  %v366_v37 = vpop.xlane.xlu2 %365  ;;  %v555_v9 = vmul.f32 %v985_v52, %v554_v27  ;;  %vm567_vm2 = vweird.f32 %v991_v19 }
  0xcf   : > { %v1626_v38 = vpop.eup %994  ;;  %v541_v41 = vmul.f32 %v1621_v24, %v1607_v57  ;;  %996 = vrsqrt.f32 %v1619_v21  ;;  %v1637_v55 = vmax.f32 %v366_v37, 1e-24  ;;  %vm568_vm8 = vmor %vm566_vm5, %vm567_vm2  ;;  %vm547_vm9 = vweird.f32 %v1621_v24 }
  0xd0   : > { %v562_v42 = vmul.f32 %v991_v19, %v561_v29  ;;  %v521_v51 = vmul.f32 %v1626_v38, %v1609_v58  ;;  %998 = vrsqrt.f32 %v1624_v36  ;;  %v559_v40 = vsel %vm558_vm4, %v985_v52, %v555_v9  ;;  %vm548_vm14 = vmor %vm546_vm7, %vm547_vm9 }
  0xd1   : > { %v542_v54 = vmul.f32 %v1621_v24, %v541_v41  ;;  %1000 = vrsqrt.f32 %v1637_v55  ;;  %v602_v52 = vmul.f32 %v559_v40, %v1430_v0  ;;  %v603_v9 = vmul.f32 %v559_v40, %v1433_v1 }
  0xd2   : > { %v563_v6 = vmul.f32 0.5, %v562_v42  ;;  %v522_v29 = vmul.f32 %v1626_v38, %v521_v51  ;;  %vm527_vm15 = vweird.f32 %v1626_v38  ;;  %vm506_vm2 = vweird.f32 %v1624_v36 }
  0xd3   : > { %v543_v20 = vmul.f32 0.5, %v542_v54  ;;  %vm528_vm0 = vmor %vm526_vm13, %vm527_vm15  ;;  %vm496_vm3 = vweird.f32 %v1619_v21 }
  0xd4   : > { %v564_v15 = vsub.f32 1.5, %v563_v6  ;;  %v369_v26 = vpop.xlane.xlu0 %368  ;;  %v523_v54 = vmul.f32 0.5, %v522_v29 }
  0xd5   : > { %v1641_v25 = vpop.eup %996  ;;  %v1644_v41 = vmax.f32 %v369_v26, 1e-24  ;;  %v360_v27 = vpop.xlane.xlu1 %359  ;;  %v513_v26 = vmul.f32 0.5, %v512_v10  ;;  %v544_v51 = vsub.f32 1.5, %v543_v20  ;;  %v535_v10 = vmul.f32 %v1611_v59, %v534_v28 }
  0xd6   : > { %v565_v37 = vmul.f32 %v991_v19, %v564_v15  ;;  %v1647_v39 = vpop.eup %998  ;;  %v491_v42 = vmul.f32 %v1641_v25, %v1619_v21  ;;  %v363_v53 = vpop.xlane.xlu2 %362  ;;  %v1662_v4 = vmax.f32 %v360_v27, 1e-24  ;;  %v524_v1 = vsub.f32 1.5, %v523_v54 }
  0xd7   : > { %1002 = vrsqrt.f32 %v1644_v41  ;;  %v501_v23 = vmul.f32 %v1647_v39, %v1624_v36  ;;  %v1665_v20 = vpop.eup %1000  ;;  %v545_v27 = vmul.f32 %v1621_v24, %v544_v51  ;;  %v514_v28 = vsub.f32 1.5, %v513_v26 }
  0xd8   : > { %v569_v56 = vsel %vm568_vm8, %v991_v19, %v565_v37  ;;  %v492_v19 = vmul.f32 %v1641_v25, %v491_v42  ;;  %1004 = vrsqrt.f32 %v1662_v4  ;;  %v471_v43 = vmul.f32 %v1665_v20, %v1637_v55 }
  0xd9   : > { %v604_v6 = vmul.f32 %v569_v56, %v1460_v12  ;;  %v605_v15 = vmul.f32 %v569_v56, %v1463_v13  ;;  %v1668_v12 = vmax.f32 %v363_v53, 1e-24  ;;  %v539_v37 = vsel %vm538_vm11, %v1611_v59, %v535_v10 }
  0xda   : > { %v502_v54 = vmul.f32 %v1647_v39, %v501_v23  ;;  %v493_v56 = vmul.f32 0.5, %v492_v19  ;;  %v549_v26 = vsel %vm548_vm14, %v1621_v24, %v545_v27  ;;  %v598_v59 = vmul.f32 %v539_v37, %v1436_v2 }
  0xdb   : > { %v620_v0 = vpack.c.bf16 %v604_v6, %v602_v52  ;;  %v621_v29 = vpack.c.bf16 %v605_v15, %v603_v9  ;;  %1006 = vrsqrt.f32 %v1668_v12  ;;  %v600_v57 = vmul.f32 %v549_v26, %v1466_v14 }
  0xdc   : > { %v354_v13 = vpop.xlane.xlu0 %353  ;;  %v601_v53 = vmul.f32 %v549_v26, %v1469_v16  ;;  %v525_v52 = vmul.f32 %v1626_v38, %v524_v1  ;;  %v599_v23 = vmul.f32 %v539_v37, %v1443_v5  ;;  %v472_v24 = vmul.f32 %v1665_v20, %v471_v43 }
  0xdd   : > { %v1671_v40 = vpop.eup %1002  ;;  %622 = vmatpush.bf16.xpose.msra.mxu0 %v620_v0  ;;  %635 = vmatpush.bf16.xpose.msra.mxu1 %v621_v29  ;;  %v357_v42 = vpop.xlane.xlu1 %356  ;;  %v515_v9 = vmul.f32 %v1617_v11, %v514_v28  ;;  %v503_v16 = vmul.f32 0.5, %v502_v54  ;;  %v618_v2 = vpack.c.bf16 %v600_v57, %v598_v59  ;;  %v1715_v5 = vmax.f32 %v354_v13, 1e-24 }
  0xde   : > { %v481_v51 = vmul.f32 %v1671_v40, %v1644_v41  ;;  %v1701_v6 = vmax.f32 %v357_v42, 1e-24  ;;  %v1705_v15 = vpop.eup %1004  ;;  %v619_v58 = vpack.c.bf16 %v601_v53, %v599_v23  ;;  %v494_v10 = vsub.f32 1.5, %v493_v56  ;;  %v348_v37 = vpop.xlane.xlu2 %347 }
  0xdf   : > { %v529_v0 = vsel %vm528_vm0, %v1626_v38, %v525_v52  ;;  %vm497_vm4 = vweird.f32 %v1641_v25  ;;  %vm507_vm5 = vweird.f32 %v1647_v39  ;;  %v473_v46 = vmul.f32 0.5, %v472_v24 }
  0xe0   : > { %v482_v19 = vmul.f32 %v1671_v40, %v481_v51  ;;  %1008 = vrsqrt.f32 %v1701_v6  ;;  %v451_v1 = vmul.f32 %v1705_v15, %v1662_v4  ;;  %v519_v38 = vsel %vm1711_vm1, %v1617_v11, %v515_v9  ;;  %vm1741_vm6 = vmor %vm496_vm3, %vm497_vm4 }
  0xe1   : > { %v1719_v29 = vpop.eup %1006  ;;  %v504_v27 = vsub.f32 1.5, %v503_v16  ;;  %1010 = vrsqrt.f32 %v1715_v5  ;;  %v596_v28 = vmul.f32 %v529_v0, %v1472_v17  ;;  %v597_v43 = vmul.f32 %v529_v0, %v1475_v18  ;;  %vm1753_vm7 = vmor %vm506_vm2, %vm507_vm5 }
  0xe2   : > { %v483_v42 = vmul.f32 0.5, %v482_v19  ;;  %v461_v54 = vmul.f32 %v1719_v29, %v1668_v12  ;;  %v495_v56 = vmul.f32 %v1641_v25, %v494_v10  ;;  %v594_v26 = vmul.f32 %v519_v38, %v1448_v7 }
  0xe3   : > { %v595_v17 = vmul.f32 %v519_v38, %v1451_v8  ;;  %v474_v57 = vsub.f32 1.5, %v473_v46  ;;  %v452_v21 = vmul.f32 %v1705_v15, %v451_v1  ;;  %v1758_v53 = vmax.f32 %v348_v37, 1e-24 }
  0xe4   : > { %v351_v13 = vpop.xlane.xlu0 %350  ;;  %vm476_vm8 = vweird.f32 %v1637_v55  ;;  %v616_v7 = vpack.c.bf16 %v596_v28, %v594_v26  ;;  %v505_v59 = vmul.f32 %v1647_v39, %v504_v27  ;;  %v484_v23 = vsub.f32 1.5, %v483_v42 }
  0xe5   : > { %623 = vmatpush.bf16.xpose.msra.mxu0 %v618_v2  ;;  %636 = vmatpush.bf16.xpose.msra.mxu1 %v619_v58  ;;  %v1747_v18 = vmax.f32 %v351_v13, 1e-24  ;;  %v617_v8 = vpack.c.bf16 %v597_v43, %v595_v17  ;;  %vm486_vm9 = vweird.f32 %v1644_v41  ;;  %v462_v36 = vmul.f32 %v1719_v29, %v461_v54 }
  0xe6   : > { %v1760_v52 = vpop.eup %1008  ;;  %v499_v24 = vsel %vm1741_vm6, %v1641_v25, %v495_v56  ;;  %vm487_vm10 = vweird.f32 %v1671_v40  ;;  %vm477_vm11 = vweird.f32 %v1665_v20  ;;  %v509_v14 = vsel %vm1753_vm7, %v1647_v39, %v505_v59  ;;  %v302_v25 = vpop.xlane.xlu1 %301  ;;  %v650_v59 = vld [vmem:[%s263_s5] sm:$0xff]  ;;  %s1096_s5 = scalar_lea.hbm %s1095_s15, 8 }
  0xe7   : > { %v1769_v9 = vpop.eup %1010  ;;  %1012 = vrsqrt.f32 %v1747_v18  ;;  %v453_v16 = vmul.f32 0.5, %v452_v21  ;;  %v441_v2 = vmul.f32 %v1760_v52, %v1701_v6  ;;  %v475_v58 = vmul.f32 %v1665_v20, %v474_v57  ;;  %vm478_vm12 = vmor %vm476_vm8, %vm477_vm11  ;;  %p1097_p10 = scmp.ne.s32.totalorder %s1095_s15, %s1096_s5  ;;  %p1102_p9 = scmp.lt.s32.totalorder %s1100_s10, %s1096_s5 }
  0xe8   : > { %1014 = vrsqrt.f32 %v1758_v53  ;;  %v590_v10 = vmul.f32 %v499_v24, %v1493_v31  ;;  %v592_v19 = vmul.f32 %v509_v14, %v1490_v30  ;;  %v591_v0 = vmul.f32 %v499_v24, %v1496_v32  ;;  %vm488_vm13 = vmor %vm486_vm9, %vm487_vm10 }
  0xe9   : > { %v593_v46 = vmul.f32 %v509_v14, %v1499_v33  ;;  %v463_v39 = vmul.f32 0.5, %v462_v36  ;;  %v431_v1 = vmul.f32 %v1769_v9, %v1715_v5  ;;  %v485_v38 = vmul.f32 %v1671_v40, %v484_v23  ;;  %p1098_p3 = pnand %p1097_p10, %p1352_p0  ;;  %p1103_p11 = por %p1102_p9, %p1101_p7 }
  0xea   : > { %v1797_v30 = vmax.f32 %v302_v25, 1e-24  ;;  %v442_v31 = vmul.f32 %v1760_v52, %v441_v2  ;;  %v454_v33 = vsub.f32 1.5, %v453_v16  ;;  %v614_v55 = vpack.c.bf16 %v592_v19, %v590_v10 }
  0xeb   : > { %v615_v13 = vpack.c.bf16 %v593_v46, %v591_v0  ;;  %v479_v27 = vsel %vm478_vm12, %v1665_v20, %v475_v58  ;;  %v464_v43 = vsub.f32 1.5, %v463_v39  ;;  %v432_v41 = vmul.f32 %v1769_v9, %v431_v1  ;;  %p1099_p5 = pneg %p1098_p3 }
  0xec   : > { %v489_v37 = vsel %vm488_vm13, %v1671_v40, %v485_v38  ;;  %vm456_vm14 = vweird.f32 %v1662_v4  ;;  %vm457_vm15 = vweird.f32 %v1705_v15  ;;  %1016 = vrsqrt.f32 %v1797_v30 }
  0xed   : > { %624 = vmatpush.bf16.xpose.msra.mxu0 %v616_v7  ;;  %637 = vmatpush.bf16.xpose.msra.mxu1 %v617_v8  ;;  %v1803_v32 = vpop.eup %1012  ;;  %vm466_vm0 = vweird.f32 %v1668_v12  ;;  %vm467_vm1 = vweird.f32 %v1719_v29  ;;  %v443_v20 = vmul.f32 0.5, %v442_v31  ;;  %v586_v42 = vmul.f32 %v479_v27, %v1502_v34  ;;  %vm458_vm2 = vmor %vm456_vm14, %vm457_vm15  ;;  %p1104_p4 = pnand %p1103_p11, %p1099_p5 }
  0xee   : > { %v1806_v28 = vpop.eup %1014  ;;  %v588_v54 = vmul.f32 %v489_v37, %v1520_v44  ;;  %v587_v40 = vmul.f32 %v479_v27, %v1505_v35  ;;  %v589_v4 = vmul.f32 %v489_v37, %v1523_v45  ;;  %v455_v56 = vmul.f32 %v1705_v15, %v454_v33  ;;  %vm468_vm3 = vmor %vm466_vm0, %vm467_vm1  ;;  %v2005_v37 = vld [vmem:[#allocation22_spill] sm:$0xff] }
  0xef   : > { %v433_v11 = vmul.f32 0.5, %v432_v41  ;;  %v421_v26 = vmul.f32 %v1803_v32, %v1747_v18  ;;  %v411_v12 = vmul.f32 %v1806_v28, %v1758_v53  ;;  %v465_v17 = vmul.f32 %v1719_v29, %v464_v43  ;;  %v2004_v43 = vld [vmem:[#allocation21_spill] sm:$0xff] }
  0xf0   : > { %v444_v35 = vsub.f32 1.5, %v443_v20  ;;  %v612_v44 = vpack.c.bf16 %v588_v54, %v586_v42  ;;  %v613_v45 = vpack.c.bf16 %v589_v4, %v587_v40  ;;  %v459_v51 = vsel %vm458_vm2, %v1705_v15, %v455_v56 }
  0xf1   : > { %v434_v57 = vsub.f32 1.5, %v433_v11  ;;  %v422_v21 = vmul.f32 %v1803_v32, %v421_v26  ;;  %v412_v7 = vmul.f32 %v1806_v28, %v411_v12  ;;  %v469_v8 = vsel %vm468_vm3, %v1719_v29, %v465_v17 }
  0xf2   : > { %v1829_v34 = vpop.eup %1016  ;;  %vm446_vm4 = vweird.f32 %v1701_v6  ;;  %vm447_vm5 = vweird.f32 %v1760_v52  ;;  %vm436_vm6 = vweird.f32 %v1715_v5  ;;  %vm437_vm7 = vweird.f32 %v1769_v9 }
  0xf3   : > { %v305_v15 = vmul.f32 %v1829_v34, %v1797_v30  ;;  %v582_v23 = vmul.f32 %v459_v51, %v1532_v49  ;;  %v1234_v36 = vmov 0   ;;  %v584_v29 = vmul.f32 %v469_v8, %v1526_v47  ;;  %vm448_vm8 = vmor %vm446_vm4, %vm447_vm5 }
  0xf4   : > { %982 = vset.pattern.permute.xlu2 %v1234_v36  ;;  %v583_v24 = vmul.f32 %v459_v51, %v1535_v50  ;;  %v585_v14 = vmul.f32 %v469_v8, %v1529_v48  ;;  %983 = vset.pattern.permute.xlu0 %v1234_v36  ;;  %v423_v16 = vmul.f32 0.5, %v422_v21  ;;  %v413_v2 = vmul.f32 0.5, %v412_v7  ;;  %vm438_vm9 = vmor %vm436_vm6, %vm437_vm7 }
  0xf5   : > { %625 = vmatpush.bf16.xpose.msra.mxu0 %v614_v55  ;;  %638 = vmatpush.bf16.xpose.msra.mxu1 %v615_v13  ;;  %v435_v25 = vmul.f32 %v1769_v9, %v434_v57  ;;  %v445_v58 = vmul.f32 %v1760_v52, %v444_v35  ;;  %v306_v47 = vmul.f32 %v1829_v34, %v305_v15  ;;  %vm426_vm10 = vweird.f32 %v1747_v18  ;;  %v2003_v13 = vld [vmem:[#allocation20_spill] sm:$0xff] }
  0xf6   : > { %657 = vperm.xlu2 %982, %v650_v59   ;;  %v610_v49 = vpack.c.bf16 %v584_v29, %v582_v23  ;;  %v611_v48 = vpack.c.bf16 %v585_v14, %v583_v24  ;;  %v424_v50 = vsub.f32 1.5, %v423_v16  ;;  %v414_v10 = vsub.f32 1.5, %v413_v2 }
  0xf7   : > { %v439_v6 = vsel %vm438_vm9, %v1769_v9, %v435_v25  ;;  %v449_v19 = vsel %vm448_vm8, %v1760_v52, %v445_v58  ;;  %vm427_vm11 = vweird.f32 %v1803_v32  ;;  %vm416_vm12 = vweird.f32 %v1758_v53 }
  0xf8   : > { %vm417_vm13 = vweird.f32 %v1806_v28  ;;  %v307_v5 = vmul.f32 0.5, %v306_v47  ;;  %v578_v0 = vmul.f32 %v439_v6, %v1553_v61  ;;  %v580_v46 = vmul.f32 %v449_v19, %v1550_v60  ;;  %vm428_vm14 = vmor %vm426_vm10, %vm427_vm11 }
  0xf9   : > { %v579_v39 = vmul.f32 %v439_v6, %v1556_v62  ;;  %v581_v9 = vmul.f32 %v449_v19, %v1559_v63  ;;  %v415_v18 = vmul.f32 %v1806_v28, %v414_v10  ;;  %v425_v52 = vmul.f32 %v1803_v32, %v424_v50  ;;  %vm418_vm15 = vmor %vm416_vm12, %vm417_vm13  ;;  %v2001_v63 = vld [vmem:[#allocation19_spill] sm:$0xff] }
  0xfa   : > { %v308_v1 = vsub.f32 1.5, %v307_v5  ;;  %v608_v38 = vpack.c.bf16 %v580_v46, %v578_v0  ;;  %vm310_vm0 = vweird.f32 %v1797_v30  ;;  %vm311_vm1 = vweird.f32 %v1829_v34 }
  0xfb   : > { %v609_v53 = vpack.c.bf16 %v581_v9, %v579_v39  ;;  %v419_v31 = vsel %vm418_vm15, %v1806_v28, %v415_v18  ;;  %v429_v33 = vsel %vm428_vm14, %v1803_v32, %v425_v52  ;;  %vm312_vm2 = vmor %vm310_vm0, %vm311_vm1  ;;  %v654_v40 = vstv %s839_s9 }
  0xfc   : > { %v309_v60 = vmul.f32 %v1829_v34, %v308_v1  ;;  %v574_v61 = vmul.f32 %v419_v31, %v1562_v3  ;;  %v576_v62 = vmul.f32 %v429_v33, %v1580_v22  ;;  %v575_v55 = vmul.f32 %v419_v31, %v2001_v63 }
  0xfd   : > { %626 = vmatpush.bf16.xpose.msra.mxu0 %v612_v44  ;;  %639 = vmatpush.bf16.xpose.msra.mxu1 %v613_v45  ;;  %v577_v27 = vmul.f32 %v429_v33, %v2003_v13  ;;  %v651_v22 = vlaneseq }
  0xfe   : > { %v606_v28 = vpack.c.bf16 %v576_v62, %v574_v61  ;;  %v313_v30 = vsel %vm312_vm2, %v1829_v34, %v309_v60 }
  0xff   : > { %v607_v32 = vpack.c.bf16 %v577_v27, %v575_v55  ;;  %v570_v41 = vmul.f32 %v313_v30, %v2004_v43  ;;  %v571_v20 = vmul.f32 %v313_v30, %v2005_v37  ;;  %v652_v54 = vand.u32 127, %v651_v22 }
 0x101   : > { %v572_v42 = vpack.c.bf16 %v570_v41, %v570_v41  ;;  %v573_v3 = vpack.c.bf16 %v571_v20, %v571_v20  ;;  %v655_v4 = vadd.s32 %v654_v40, %v652_v54 }
 0x105   : > { %627 = vmatpush.bf16.xpose.msra.mxu0 %v610_v49  ;;  %640 = vmatpush.bf16.xpose.msra.mxu1 %v611_v48 }
 0x10d   : > { %628 = vmatpush.bf16.xpose.msra.mxu0 %v608_v38  ;;  %641 = vmatpush.bf16.xpose.msra.mxu1 %v609_v53 }
 0x115   : > { %629 = vmatpush.bf16.xpose.msra.mxu0 %v606_v28  ;;  %642 = vmatpush.bf16.xpose.msra.mxu1 %v607_v32 }
 0x11c   : > { %630 = vmatmul.bf16.vlgmr.msra.gmra.mxu0 %v572_v42  ;;  %643 = vmatmul.bf16.vlgmr.msra.gmra.mxu1 %v573_v3 }
 0x150   : > { %v658_v56 = vpop.permute.xlu2 %657 }
 0x151   : > { %vm659_vm3 = vcmp.eq.s32.totalorder %v655_v4, %v658_v56 }
 0x199   : > { %v631_v11 = vpop.f32.mrf.mxu0  ;;  %v644_v26 = vpop.f32.mrf.mxu1 }
 0x19a   : > { %v645_v12 = vadd.f32 %v644_v26, %v631_v11 }
 0x19c   : > { %v838_v17 = vclamps-f32 %v645_v12, 0.999999 }
 0x19e   : > { %v660_v34 = vsel %vm659_vm3, %v838_v17, 0.0 }
 0x19f   : > { %661 = vadd.xlane.f32.xlu0 %v660_v34 }
 0x1a1   : > { %v633_v35 = vpop.f32.mrf.mxu0  ;;  %v646_v44 = vpop.f32.mrf.mxu1 }
 0x212   : > { %v662_v45 = vpop.xlane.xlu0 %661 }
 0x213   : > { %v664_v51 = vmul.f32 %v662_v45, %v662_v45  ;;  %v663_v2 = vmul.f32 0.87758255, %v662_v45  ;;  %vm681_vm6 = vcmp.ge.f32.partialorder %v662_v45, 0.5403023 }
 0x215   : > { %v665_v57 = vsub.f32 1.0, %v664_v51 }
 0x217   : > { %v666_v21 = vmax.f32 %v665_v57, 0.0 }
 0x219   : > { %1018 = vrsqrt.f32 %v666_v21  ;;  %vm674_vm4 = vcmp.eq.f32.partialorder %v666_v21, inf  ;;  %v677_v24 = vand.u32 2147483648, %v666_v21  ;;  %vm676_vm5 = vcmp.eq.f32.partialorder %v666_v21, 0.0 }
 0x21f   : > { %v1019_v7 = vpop.eup %1018 }
 0x220   : > { %v668_v8 = vmul.f32 %v1019_v7, %v666_v21 }
 0x222   : > { %v669_v59 = vmul.f32 %v1019_v7, %v668_v8 }
 0x224   : > { %v670_v15 = vmul.f32 0.5, %v669_v59 }
 0x226   : > { %v671_v23 = vsub.f32 1.5, %v670_v15 }
 0x228   : > { %v672_v36 = vmul.f32 %v1019_v7, %v671_v23 }
 0x22a   : > { %v673_v29 = vmul.f32 %v672_v36, %v666_v21 }
 0x22c   : > { %v675_v14 = vsel %vm674_vm4, %v666_v21, %v673_v29 }
 0x22d   : > { %v678_v16 = vsel %vm676_vm5, %v677_v24, %v675_v14 }
 0x22e   : > { %v679_v25 = vmul.f32 0.47942555, %v678_v16 }
 0x230   : > { %v680_v58 = vsub.f32 %v663_v2, %v679_v25 }
 0x232   : > { %v682_v47 = vsel %vm681_vm6, %v680_v58, 0.0707372 }
 0x233   : > { %v683_v49 = vsel %vm659_vm3, %v682_v47, %v838_v17 }
 0x234   : > { %v684_v48 = vmul.f32 64.0, %v683_v49 }
 0x236   : > { %685 = vst [vmem:[%s258_s4] sm:$0xff] %v684_v48 }
 0x237   : > { %1107 = shalt.err (!%p1104_p4)
}
 0x238   : > { %852 = dma.vmem_to_hbm [thread:$0]  (%p1352_p0), %s702_s6, 128, %s704_s11, %s687_s30  }
 0x239 PF: > { %s2010_s29 = sld [smem:[#allocation15_spill]] }
 0x23a   : > { %s2011_s13 = sld [smem:[#allocation11_spill]] }
 0x23f   : > { %p866_p8 = scmp.ge.s32.totalorder %s2010_s29, 2 }
 0x240   : > { %s715_s21 = sand.u32 1, %s2011_s13  }
 0x241   : > { %p862_p12 = pnand %p866_p8, %p1356_p1  ;;  %s716_s25 = scalar_lea.sflag [#allocation4], %s715_s21 }
 0x243   : > { %p863_p13 = pneg %p862_p12 }
 0x245   : > { %1173 = dma.done.wait (%p863_p13), %s716_s25, 128  }
 0x246   : > { %1175 = vsyncadd (%p863_p13), %s716_s25, 4294967168  ;;  %s22_s25 = sadd.s32 1, %s2010_s29   ;;  %s2014_s12 = sld [smem:[#allocation12_spill]] }
 0x247   : > { %p1902_p2 = scmp.ge.s32.totalorder %s22_s25, 10   ;;  %s2015_s21 = sld [smem:[#allocation14_spill]] }
 0x248   : > { %s2016_s8 = sld [smem:[#allocation18_spill]]  ;;  %s2018_s13 = smov %s1186_s14 }
 0x249   : > { %s2019_s14 = smov %s1408_s18  ;;  %s2020_s15 = smov %s1194_s16 }
 0x24a   : > { %s2021_s16 = smov %s1198_s17  ;;  %s2022_s17 = smov %s1395_s0 }
 0x24b   : > { %s2023_s18 = smov %s1206_s19  ;;  %s2024_s19 = smov %s1210_s20 }
 0x24c   : > { %s2025_s20 = smov %s1405_s2  ;;  %s2026_s22 = smov %s1226_s24 }
 0x24d   : > { %s2028_s24 = smov %s2034_s26  ;;  %21 = sbr.rel (!%p1902_p2) target bundleno = 16 (0x10), region = 93 }
 0x24e   : > { %s2027_s23 = smov %s2016_s8 }
 0x252   :  { %722 = vsyncpa [#allocation3], 1 }
 0x253   :  { %724 = vsyncpa [#allocation3 + $0x1], 1 }
 0x254   :  { %725 = vsyncpa [#allocation6], 1 }
 0x255   :  { %727 = vsyncpa [#allocation6 + $0x1], 1 }
 0x256   :  { %728 = vsyncpa [#allocation4], 1 }
 0x257   :  { %730 = vsyncpa [#allocation4 + $0x1], 1 }

</bundles_post_ra>
